<compile_context>
chip_gen: v6e
topology: v6e:2x2x1
jax: 0.10.0
libtpu: 0.0.40
codegen_flags: <defaults>
</compile_context>

<pallas_src>
from functools import partial

import numpy as np
import jax
import jax.numpy as jnp
from jax import lax
from jax.experimental import pallas as pl
from jax.experimental.pallas import tpu as pltpu

N_QUBITS = 4
Q_DEPTH = 8
Q_DELTA = 0.01
DIM = 2 ** N_QUBITS          # 16
IN_FEATURES = 512
OUT_FEATURES = 5
PAD8 = 8                     # qubit / output row axes padded to one full sublane group


# ---------------- constant circuit operators (parameter setup / glue) ----------------
def _kron_all(mats):
    out = mats[0]
    for m in mats[1:]:
        out = np.kron(out, m)
    return out


def _single_qubit_full(m2, wire):
    """Full 16x16 operator for a 2x2 gate on `wire` (wire 0 = most significant bit)."""
    mats = [np.eye(2, dtype=np.float64)] * N_QUBITS
    mats[wire] = m2
    return _kron_all(mats)


def _cnot_full(control, target):
    p = np.zeros((DIM, DIM), dtype=np.float64)
    for i in range(DIM):
        bits = [(i >> (N_QUBITS - 1 - w)) & 1 for w in range(N_QUBITS)]
        if bits[control] == 1:
            bits[target] ^= 1
        j = 0
        for w in range(N_QUBITS):
            j = (j << 1) | bits[w]
        p[j, i] = 1.0
    return p


def _build_circuit_constants():
    # RY(theta) = cos(theta/2) * I + sin(theta/2) * A, with A = [[0,-1],[1,0]]
    a2 = np.array([[0.0, -1.0], [1.0, 0.0]])
    # A_w^T stacked (row-vector convention): state_row <- state_row @ AT[w]
    at = np.stack([_single_qubit_full(a2, w).T for w in range(N_QUBITS)], axis=0)
    # entangling layer (column convention): CNOT(0,1), CNOT(2,3), then CNOT(1,2)
    e = _cnot_full(1, 2) @ _cnot_full(2, 3) @ _cnot_full(0, 1)
    et = e.T
    # PauliZ expval signs: <Z_w> = sum_i state_i^2 * (+1 if bit_w(i)==0 else -1)
    zs = np.zeros((DIM, N_QUBITS), dtype=np.float64)
    # Encoding-layer sign table (transposed): factor_w(i) = c_w + sgn_t[i,w] * s_w, with
    # sgn = +1 for bit 1, -1 for bit 0 (H|0> then RY closed form).
    sgn_t = np.zeros((DIM, N_QUBITS), dtype=np.float64)
    for i in range(DIM):
        for w in range(N_QUBITS):
            bit = (i >> (N_QUBITS - 1 - w)) & 1
            zs[i, w] = 1.0 - 2.0 * bit
            sgn_t[i, w] = -1.0 + 2.0 * bit
    return (jnp.asarray(at, jnp.float32),
            jnp.asarray(et, jnp.float32),
            jnp.asarray(zs, jnp.float32),
            jnp.asarray(sgn_t, jnp.float32))


def _fold_circuit(q_params, at, et):
    """Exact fold of the 8 variational layers into one right-multiplying (16,16) matrix.

    Row-vector convention: one layer is  state <- state @ [ET @ prod_w (qc I + qs AT_w)],
    so the full circuit is state @ (L_0 @ L_1 @ ... @ L_{Q_DEPTH-1}).
    Tiny 16x16 algebra -> plain JAX (fused into the jitted wrapper).
    """
    qc = jnp.cos(q_params * 0.5)
    qs = jnp.sin(q_params * 0.5)
    eye = jnp.eye(DIM, dtype=jnp.float32)
    m = eye
    for k in range(Q_DEPTH):
        layer = et
        for w in range(N_QUBITS):
            layer = layer @ (qc[k, w] * eye + qs[k, w] * at[w])
        m = m @ layer
    return m


# ---------------------------------- Pallas kernel ------------------------------------
def dressed_qnet_kernel(x_ref, wpre_t_ref, bpre_t_ref, sgn_t_ref, m_t_ref,
                        zw_t_ref, bpost_t_ref, out_ref):
    # pre_net, transposed + lane-dense: (8,512)bf16 . (tm,512)bf16 -> (8, tm) f32.
    # Contraction on both last dims (same pattern as attention q.k^T); batch -> lanes.
    x = x_ref[...].astype(jnp.bfloat16)                     # cast in VMEM, no HBM pass
    pre_t = lax.dot_general(wpre_t_ref[...], x, (((1,), (1,)), ((), ())),
                            preferred_element_type=jnp.float32) + bpre_t_ref[...]

    # q_in = tanh(pre) * pi/2 ; RY half-angles = q_in / 2   (all on (8, tm), lane-dense)
    half = jnp.tanh(pre_t) * (np.pi / 4.0)
    c = jnp.cos(half)
    s = jnp.sin(half)

    # H layer + input-encoding RY layer, tensor-product closed form:
    #   state_t[i, m] = 0.25 * prod_w (c[w, m] + sgn_t[i, w] * s[w, m])
    sgn_t = sgn_t_ref[...]                                   # (16, 4)
    state_t = c[0:1, :] + sgn_t[:, 0:1] * s[0:1, :]          # (16, tm)
    for w in range(1, N_QUBITS):
        state_t = state_t * (c[w:w + 1, :] + sgn_t[:, w:w + 1] * s[w:w + 1, :])
    state_t = state_t * 0.25

    # all 8 variational layers folded into a single (16,16) matrix (column convention)
    state_t = jnp.dot(m_t_ref[...], state_t, preferred_element_type=jnp.float32)

    # PauliZ expvals folded with post_net: (8,16) @ (state^2) + b  ->  (8, tm)
    out_ref[...] = (jnp.dot(zw_t_ref[...], state_t * state_t,
                            preferred_element_type=jnp.float32) + bpost_t_ref[...])


@partial(jax.jit, static_argnames=("tm",))
def dressed_quantum_net(x, params, *, tm=1024):
    b = x.shape[0]

    # ---- parameter folding (tiny, fused into this jit) ----
    m_t = _fold_circuit(params["q_params"], params["at"], params["et"]).T    # (16,16)
    zw = params["zs"] @ params["w_post"]                                     # (16,5)
    zw_t = jnp.zeros((PAD8, DIM), jnp.float32).at[:OUT_FEATURES].set(zw.T)   # (8,16)
    bpost_t = jnp.zeros((PAD8, 1), jnp.float32).at[:OUT_FEATURES].set(params["b_post"].T)
    wpre_t = (jnp.zeros((PAD8, IN_FEATURES), jnp.float32)
              .at[:N_QUBITS].set(params["w_pre"].T).astype(jnp.bfloat16))    # (8,512)
    bpre_t = jnp.zeros((PAD8, 1), jnp.float32).at[:N_QUBITS].set(params["b_pre"].T)

    # ---- batch tiling: multiple-of-128 tiles (lane-dense stores), no pad copy of x ----
    tm = max(128, (int(tm) // 128) * 128)
    if b < 256:
        tm_eff = b                                   # single block; dims == array dims
    else:
        # >= 2 grid steps so both v7x TensorCores get work; ragged last tile is masked
        tm_eff = min(tm, max(128, (pl.cdiv(b, 2) // 128) * 128))
    grid = (pl.cdiv(b, tm_eff),)

    out_t = pl.pallas_call(
        dressed_qnet_kernel,
        out_shape=jax.ShapeDtypeStruct((PAD8, b), jnp.float32),
        grid=grid,
        in_specs=[
            pl.BlockSpec((tm_eff, IN_FEATURES), lambda i: (i, 0)),     # x (streamed)
            pl.BlockSpec((PAD8, IN_FEATURES), lambda i: (0, 0)),       # w_pre^T (bf16)
            pl.BlockSpec((PAD8, 1), lambda i: (0, 0)),                 # b_pre^T
            pl.BlockSpec((DIM, N_QUBITS), lambda i: (0, 0)),           # sgn table
            pl.BlockSpec((DIM, DIM), lambda i: (0, 0)),                # folded circuit
            pl.BlockSpec((PAD8, DIM), lambda i: (0, 0)),               # (zs @ w_post)^T
            pl.BlockSpec((PAD8, 1), lambda i: (0, 0)),                 # b_post^T
        ],
        out_specs=pl.BlockSpec((PAD8, tm_eff), lambda i: (0, i)),
        compiler_params=pltpu.CompilerParams(
            dimension_semantics=("parallel",),       # shards batch tiles across TCs
            vmem_limit_bytes=32 * 1024 * 1024),
    )(x, wpre_t, bpre_t, params["sgn_t"], m_t, zw_t, bpost_t)

    return out_t[:OUT_FEATURES].T                    # (b, 5)


# ------------------------------- pure-JAX reference ----------------------------------
def reference_forward(x, params, pre_dtype=jnp.float32):
    """Unfolded reference (original gate-by-gate loops). `pre_dtype` mirrors the
    kernel's in-VMEM bf16 cast so the folding/restructuring is validated tightly."""
    xw = jnp.dot(x.astype(pre_dtype), params["w_pre"].astype(pre_dtype),
                 preferred_element_type=jnp.float32)
    pre = xw + params["b_pre"]
    q_in = jnp.tanh(pre) * (np.pi / 2.0)
    c, s = jnp.cos(q_in * 0.5), jnp.sin(q_in * 0.5)
    at, et, zs = params["at"], params["et"], params["zs"]
    qc = jnp.cos(params["q_params"] * 0.5)
    qs = jnp.sin(params["q_params"] * 0.5)
    state = jnp.full((x.shape[0], DIM), 0.25, jnp.float32)
    for w in range(N_QUBITS):
        state = c[:, w:w + 1] * state + s[:, w:w + 1] * (state @ at[w])
    for k in range(Q_DEPTH):
        state = state @ et
        for w in range(N_QUBITS):
            state = qc[k, w] * state + qs[k, w] * (state @ at[w])
    expvals = (state * state) @ zs
    return expvals @ params["w_post"] + params["b_post"]


# --------------------------------------- main ----------------------------------------
if __name__ == "__main__":
    B = 256                              # small, but gives a 2-step batch grid at tm=128
    key = jax.random.PRNGKey(0)
    k1, k2, k3, k4, k5, k6 = jax.random.split(key, 6)

    lim_pre = 1.0 / np.sqrt(IN_FEATURES)
    lim_post = 1.0 / np.sqrt(N_QUBITS)
    at, et, zs, sgn_t = _build_circuit_constants()
    params = {
        "w_pre": jax.random.uniform(k1, (IN_FEATURES, N_QUBITS), jnp.float32,
                                    -lim_pre, lim_pre),
        "b_pre": jax.random.uniform(k2, (1, N_QUBITS), jnp.float32, -lim_pre, lim_pre),
        "q_params": Q_DELTA * jax.random.normal(k3, (Q_DEPTH, N_QUBITS), jnp.float32),
        "w_post": jax.random.uniform(k4, (N_QUBITS, OUT_FEATURES), jnp.float32,
                                     -lim_post, lim_post),
        "b_post": jax.random.uniform(k5, (1, OUT_FEATURES), jnp.float32,
                                     -lim_post, lim_post),
        "at": at, "et": et, "zs": zs, "sgn_t": sgn_t,
    }

    x = jax.random.normal(k6, (B, IN_FEATURES), jnp.float32)

    # tm=128 so the batch grid (2 steps) and the pipeline are actually exercised
    out = jax.block_until_ready(dressed_quantum_net(x, params, tm=128))
    assert out.shape == (B, OUT_FEATURES)

    # tight check vs. a reference that mirrors the kernel's bf16 pre-net cast
    # (validates the circuit folding / closed-form encoding / transposed restructure)
    ref_bf = jax.block_until_ready(reference_forward(x, params, pre_dtype=jnp.bfloat16))
    np.testing.assert_allclose(np.asarray(out), np.asarray(ref_bf), rtol=2e-3, atol=2e-3)

    # sanity check vs. the pure-f32 original semantics (bf16 pre-net is the only delta)
    ref_f32 = jax.block_until_ready(reference_forward(x, params))
    np.testing.assert_allclose(np.asarray(out), np.asarray(ref_f32), rtol=5e-2, atol=5e-2)

    print("KERNEL_OK")
</pallas_src>

<mosaic_0001>
module attributes {stable_mosaic.version = 11 : i64} {
  func.func @dressed_qnet_kernel(%arg0: i32, %arg1: memref<128x512xf32, #tpu.memory_space<vmem>>, %arg2: memref<8x512xbf16, #tpu.memory_space<vmem>>, %arg3: memref<8x1xf32, #tpu.memory_space<vmem>>, %arg4: memref<16x4xf32, #tpu.memory_space<vmem>>, %arg5: memref<16x16xf32, #tpu.memory_space<vmem>>, %arg6: memref<8x16xf32, #tpu.memory_space<vmem>>, %arg7: memref<8x1xf32, #tpu.memory_space<vmem>>, %arg8: memref<8x128xf32, #tpu.memory_space<vmem>>) attributes {dimension_semantics = [#tpu.dimension_semantics<parallel>], iteration_bounds = array<i64: 2>, scalar_prefetch = 0 : i64, scratch_operands = 0 : i64, tpu.core_type = #tpu.core_type<tc>, window_params = [{transform_indices = @transform_0, window_bounds = array<i64: 128, 512>}, {pipeline_mode = #tpu.pipeline_mode<synchronous>, transform_indices = @transform_1, window_bounds = array<i64: 8, 512>}, {pipeline_mode = #tpu.pipeline_mode<synchronous>, transform_indices = @transform_2, window_bounds = array<i64: 8, 1>}, {pipeline_mode = #tpu.pipeline_mode<synchronous>, transform_indices = @transform_3, window_bounds = array<i64: 16, 4>}, {pipeline_mode = #tpu.pipeline_mode<synchronous>, transform_indices = @transform_4, window_bounds = array<i64: 16, 16>}, {pipeline_mode = #tpu.pipeline_mode<synchronous>, transform_indices = @transform_5, window_bounds = array<i64: 8, 16>}, {pipeline_mode = #tpu.pipeline_mode<synchronous>, transform_indices = @transform_6, window_bounds = array<i64: 8, 1>}, {transform_indices = @transform_7, window_bounds = array<i64: 8, 128>}]} {
    %c0 = arith.constant 0 : index
    %c0_0 = arith.constant 0 : index
    %0 = vector.load %arg1[%c0, %c0_0] : memref<128x512xf32, #tpu.memory_space<vmem>>, vector<128x512xf32>
    %1 = arith.truncf %0 : vector<128x512xf32> to vector<128x512xbf16>
    %c0_1 = arith.constant 0 : index
    %c0_2 = arith.constant 0 : index
    %2 = vector.load %arg2[%c0_1, %c0_2] : memref<8x512xbf16, #tpu.memory_space<vmem>>, vector<8x512xbf16>
    %cst = arith.constant dense<0.000000e+00> : vector<8x128xf32>
    %3 = tpu.matmul %2, %1, %cst {dimension_numbers = #tpu.dot_dimension_numbers<[1], [1], [0], [0], [0, 0, 1, 0], [], []>} : vector<8x512xbf16>, vector<128x512xbf16>, vector<8x128xf32> -> vector<8x128xf32>
    %c0_3 = arith.constant 0 : index
    %c0_4 = arith.constant 0 : index
    %4 = vector.load %arg3[%c0_3, %c0_4] : memref<8x1xf32, #tpu.memory_space<vmem>>, vector<8x1xf32>
    %5 = vector.broadcast %4 : vector<8x1xf32> to vector<8x128xf32>
    %6 = arith.addf %3, %5 : vector<8x128xf32>
    %7 = math.tanh %6 : vector<8x128xf32>
    %cst_5 = arith.constant 0.785398185 : f32
    %8 = vector.broadcast %cst_5 : f32 to vector<8x128xf32>
    %9 = arith.mulf %7, %8 : vector<8x128xf32>
    %10 = math.cos %9 : vector<8x128xf32>
    %11 = math.sin %9 : vector<8x128xf32>
    %c0_6 = arith.constant 0 : index
    %c0_7 = arith.constant 0 : index
    %12 = vector.load %arg4[%c0_6, %c0_7] : memref<16x4xf32, #tpu.memory_space<vmem>>, vector<16x4xf32>
    %13 = vector.extract_strided_slice %10 {offsets = [0, 0], sizes = [1, 128], strides = [1, 1]} : vector<8x128xf32> to vector<1x128xf32>
    %14 = vector.extract_strided_slice %12 {offsets = [0, 0], sizes = [16, 1], strides = [1, 1]} : vector<16x4xf32> to vector<16x1xf32>
    %15 = vector.extract_strided_slice %11 {offsets = [0, 0], sizes = [1, 128], strides = [1, 1]} : vector<8x128xf32> to vector<1x128xf32>
    %16 = vector.broadcast %14 : vector<16x1xf32> to vector<16x128xf32>
    %17 = vector.broadcast %15 : vector<1x128xf32> to vector<16x128xf32>
    %18 = arith.mulf %16, %17 : vector<16x128xf32>
    %19 = vector.broadcast %13 : vector<1x128xf32> to vector<16x128xf32>
    %20 = arith.addf %19, %18 : vector<16x128xf32>
    %21 = vector.extract_strided_slice %10 {offsets = [1, 0], sizes = [1, 128], strides = [1, 1]} : vector<8x128xf32> to vector<1x128xf32>
    %22 = vector.extract_strided_slice %12 {offsets = [0, 1], sizes = [16, 1], strides = [1, 1]} : vector<16x4xf32> to vector<16x1xf32>
    %23 = vector.extract_strided_slice %11 {offsets = [1, 0], sizes = [1, 128], strides = [1, 1]} : vector<8x128xf32> to vector<1x128xf32>
    %24 = vector.broadcast %22 : vector<16x1xf32> to vector<16x128xf32>
    %25 = vector.broadcast %23 : vector<1x128xf32> to vector<16x128xf32>
    %26 = arith.mulf %24, %25 : vector<16x128xf32>
    %27 = vector.broadcast %21 : vector<1x128xf32> to vector<16x128xf32>
    %28 = arith.addf %27, %26 : vector<16x128xf32>
    %29 = arith.mulf %20, %28 : vector<16x128xf32>
    %30 = vector.extract_strided_slice %10 {offsets = [2, 0], sizes = [1, 128], strides = [1, 1]} : vector<8x128xf32> to vector<1x128xf32>
    %31 = vector.extract_strided_slice %12 {offsets = [0, 2], sizes = [16, 1], strides = [1, 1]} : vector<16x4xf32> to vector<16x1xf32>
    %32 = vector.extract_strided_slice %11 {offsets = [2, 0], sizes = [1, 128], strides = [1, 1]} : vector<8x128xf32> to vector<1x128xf32>
    %33 = vector.broadcast %31 : vector<16x1xf32> to vector<16x128xf32>
    %34 = vector.broadcast %32 : vector<1x128xf32> to vector<16x128xf32>
    %35 = arith.mulf %33, %34 : vector<16x128xf32>
    %36 = vector.broadcast %30 : vector<1x128xf32> to vector<16x128xf32>
    %37 = arith.addf %36, %35 : vector<16x128xf32>
    %38 = arith.mulf %29, %37 : vector<16x128xf32>
    %39 = vector.extract_strided_slice %10 {offsets = [3, 0], sizes = [1, 128], strides = [1, 1]} : vector<8x128xf32> to vector<1x128xf32>
    %40 = vector.extract_strided_slice %12 {offsets = [0, 3], sizes = [16, 1], strides = [1, 1]} : vector<16x4xf32> to vector<16x1xf32>
    %41 = vector.extract_strided_slice %11 {offsets = [3, 0], sizes = [1, 128], strides = [1, 1]} : vector<8x128xf32> to vector<1x128xf32>
    %42 = vector.broadcast %40 : vector<16x1xf32> to vector<16x128xf32>
    %43 = vector.broadcast %41 : vector<1x128xf32> to vector<16x128xf32>
    %44 = arith.mulf %42, %43 : vector<16x128xf32>
    %45 = vector.broadcast %39 : vector<1x128xf32> to vector<16x128xf32>
    %46 = arith.addf %45, %44 : vector<16x128xf32>
    %47 = arith.mulf %38, %46 : vector<16x128xf32>
    %cst_8 = arith.constant 2.500000e-01 : f32
    %48 = vector.broadcast %cst_8 : f32 to vector<16x128xf32>
    %49 = arith.mulf %47, %48 : vector<16x128xf32>
    %c0_9 = arith.constant 0 : index
    %c0_10 = arith.constant 0 : index
    %50 = vector.load %arg5[%c0_9, %c0_10] : memref<16x16xf32, #tpu.memory_space<vmem>>, vector<16x16xf32>
    %cst_11 = arith.constant dense<0.000000e+00> : vector<16x128xf32>
    %51 = tpu.matmul %50, %49, %cst_11 {dimension_numbers = #tpu.dot_dimension_numbers<[1], [0], [0], [1], [0, 0, 1, 1], [], []>} : vector<16x16xf32>, vector<16x128xf32>, vector<16x128xf32> -> vector<16x128xf32>
    %c0_12 = arith.constant 0 : index
    %c0_13 = arith.constant 0 : index
    %52 = vector.load %arg6[%c0_12, %c0_13] : memref<8x16xf32, #tpu.memory_space<vmem>>, vector<8x16xf32>
    %53 = arith.mulf %51, %51 : vector<16x128xf32>
    %cst_14 = arith.constant dense<0.000000e+00> : vector<8x128xf32>
    %54 = tpu.matmul %52, %53, %cst_14 {dimension_numbers = #tpu.dot_dimension_numbers<[1], [0], [0], [1], [0, 0, 1, 1], [], []>} : vector<8x16xf32>, vector<16x128xf32>, vector<8x128xf32> -> vector<8x128xf32>
    %c0_15 = arith.constant 0 : index
    %c0_16 = arith.constant 0 : index
    %55 = vector.load %arg7[%c0_15, %c0_16] : memref<8x1xf32, #tpu.memory_space<vmem>>, vector<8x1xf32>
    %56 = vector.broadcast %55 : vector<8x1xf32> to vector<8x128xf32>
    %57 = arith.addf %54, %56 : vector<8x128xf32>
    %c0_17 = arith.constant 0 : index
    %c0_18 = arith.constant 0 : index
    %58 = vector.load %arg8[%c0_17, %c0_18] : memref<8x128xf32, #tpu.memory_space<vmem>>, vector<8x128xf32>
    tpu.vector_store %arg8[%c0_17, %c0_18], %57 {strides = array<i32>} : memref<8x128xf32, #tpu.memory_space<vmem>>, vector<8x128xf32>,
    return
  }
  func.func @transform_0(%arg0: i32) -> (i32, i32) {
    %c0_i32 = arith.constant 0 : i32
    %c0_i32_0 = arith.constant 0 : i32
    return %arg0, %c0_i32 : i32, i32
  }
  func.func @transform_1(%arg0: i32) -> (i32, i32) {
    %c0_i32 = arith.constant 0 : i32
    %c0_i32_0 = arith.constant 0 : i32
    %c0_i32_1 = arith.constant 0 : i32
    return %c0_i32, %c0_i32_0 : i32, i32
  }
  func.func @transform_2(%arg0: i32) -> (i32, i32) {
    %c0_i32 = arith.constant 0 : i32
    %c0_i32_0 = arith.constant 0 : i32
    %c0_i32_1 = arith.constant 0 : i32
    return %c0_i32, %c0_i32_0 : i32, i32
  }
  func.func @transform_3(%arg0: i32) -> (i32, i32) {
    %c0_i32 = arith.constant 0 : i32
    %c0_i32_0 = arith.constant 0 : i32
    %c0_i32_1 = arith.constant 0 : i32
    return %c0_i32, %c0_i32_0 : i32, i32
  }
  func.func @transform_4(%arg0: i32) -> (i32, i32) {
    %c0_i32 = arith.constant 0 : i32
    %c0_i32_0 = arith.constant 0 : i32
    %c0_i32_1 = arith.constant 0 : i32
    return %c0_i32, %c0_i32_0 : i32, i32
  }
  func.func @transform_5(%arg0: i32) -> (i32, i32) {
    %c0_i32 = arith.constant 0 : i32
    %c0_i32_0 = arith.constant 0 : i32
    %c0_i32_1 = arith.constant 0 : i32
    return %c0_i32, %c0_i32_0 : i32, i32
  }
  func.func @transform_6(%arg0: i32) -> (i32, i32) {
    %c0_i32 = arith.constant 0 : i32
    %c0_i32_0 = arith.constant 0 : i32
    %c0_i32_1 = arith.constant 0 : i32
    return %c0_i32, %c0_i32_0 : i32, i32
  }
  func.func @transform_7(%arg0: i32) -> (i32, i32) {
    %c0_i32 = arith.constant 0 : i32
    %c0_i32_0 = arith.constant 0 : i32
    return %c0_i32, %arg0 : i32, i32
  }
}

</mosaic_0001>

<bundles_post_ra>
// kernel: dressed_quantum_net.1
= control target key start
LH: loop header
LB: loop body
LE: loop exit
PB: predicated region body
PF: predicated region fallthrough
CT: control target
= control target key end

     0   :  { %s1153_s24 = smov 0   ;;  %s1314_s0 = inlined_call_operand.vmem [shape: f32[256,512], index: 0, kind: input, shape index: {}]   ;;  %s1315_s1 = inlined_call_operand.vmem [shape: bf16[8,512], index: 1, kind: input, shape index: {}]   ;;  %s1316_s2 = inlined_call_operand.vmem [shape: f32[8,1], index: 2, kind: input, shape index: {}]   ;;  %s1317_s3 = inlined_call_operand.vmem [shape: f32[16,4], index: 3, kind: input, shape index: {}]   ;;  %s1318_s4 = inlined_call_operand.vmem [shape: f32[16,16], index: 4, kind: input, shape index: {}]   ;;  %s1319_s5 = inlined_call_operand.vmem [shape: f32[8,16], index: 5, kind: input, shape index: {}]   ;;  %s1320_s6 = inlined_call_operand.vmem [shape: f32[8,1], index: 6, kind: input, shape index: {}]   ;;  %s1321_s7 = inlined_call_operand.vmem [shape: f32[8,256], index: 7, kind: output, shape index: {}]  }
   0x1 LB: > { %s1159_s25 = sadd.s32 4294967295, %s1099_s24   ;;  %p1006_p0 = scmp.ge.s32.totalorder %s1099_s24, 1  ;;  %s1099_s24 = sphi %s1153_s24, %s17_s24  }
   0x2   : > { %p239_p1 = scmp.lt.s32.totalorder %s1099_s24, 3 }
   0x4   : > { %p240_p2 = pnand %p1006_p0, %p239_p1 }
   0x5   : > { %s1007_s26 = sshll.u32 (!%p240_p2), %s1159_s25, 4  ;;  %p278_p4 = scmp.lt.s32.totalorder (!%p240_p2), %s1159_s25, 1 }
   0x6   : > { %243 = sbr.rel (%p240_p2) target bundleno = 789 (0x315), region = 48  ;;  %p272_p3 = scmp.lt.s32.totalorder (!%p240_p2), %s1007_s26, 31 }
   0xb   : > { %v1167_v0 = vld [vmem:[%s1315_s1] sm:$0xff]  ;;  %v1172_v1 = vld [vmem:[%s1315_s1 + $0x8] sm:$0xff]  ;;  %v1101_v5 = vmov 0   ;;  %v1102_v6 = vmov 1   ;;  %s1323_s26 = smov (!%p272_p3, %s1007_s26), 31  ;;  %v1103_v35 = vmov 2  }
   0xc   : > { %v381_v2 = vld [vmem:[%s1316_s2] sm:$0xff]  ;;  %v1012_v3 = vcombine.high %v1167_v0, %v1167_v0  ;;  %v1014_v4 = vcombine.high %v1172_v1, %v1172_v1  ;;  %1074 = vset.pattern.permute.xlu0 %v1101_v5  ;;  %1075 = vset.pattern.permute.xlu1 %v1102_v6  ;;  %v691_v7 = vld [vmem:[%s1317_s3 + $0x8] sm:$0xff]  ;;  %s1028_s12 = sshll.u32 %s1323_s26, 5  ;;  %v1104_v39 = vmov 3   ;;  %vm784_vm0 = vcmask 130048   ;;  %s1325_s25 = smov (!%p278_p4, %s1159_s25), 1 }
   0xd   : > { %384 = vperm.xlu0 %1074, %v381_v2   ;;  %719 = vperm.xlu1 %1075, %v691_v7   ;;  %s1188_s15 = scalar_lea.vmem %s1314_s0, %s1028_s12  ;;  %v1193_v8 = vld [vmem:[%s1317_s3] sm:$0xff]  ;;  %s1010_s28 = sshll.u32 %s1325_s25, 3 }
   0xe   : > { %433 = vmatprep.mubr.bf16.mxu0 %v1012_v3  ;;  %473 = vmatprep.mubr.bf16.mxu1 %v1014_v4  ;;  %v340_v9 = vld [vmem:[%s1188_s15 + $0x1c8] sm:$0xff]  ;;  %v342_v11 = vld [vmem:[%s1188_s15 + $0x1d8] sm:$0xff]  ;;  %v339_v14 = vld [vmem:[%s1188_s15 + $0x1c0] sm:$0xff]  ;;  %s281_s8 = scalar_lea.vmem %s1321_s7, %s1010_s28 }
   0xf   : > { %v344_v10 = vld [vmem:[%s1188_s15 + $0x1e8] sm:$0xff]  ;;  %v346_v13 = vld [vmem:[%s1188_s15 + $0x1f8] sm:$0xff]  ;;  %v343_v15 = vld [vmem:[%s1188_s15 + $0x1e0] sm:$0xff] }
  0x10   : > { %v376_v12 = vpack.c.bf16 %v344_v10, %v340_v9  ;;  %v378_v16 = vpack.c.bf16 %v346_v13, %v342_v11  ;;  %v375_v17 = vpack.c.bf16 %v343_v15, %v339_v14  ;;  %v341_v18 = vld [vmem:[%s1188_s15 + $0x1d0] sm:$0xff]  ;;  %v332_v20 = vld [vmem:[%s1188_s15 + $0x188] sm:$0xff]  ;;  %v334_v23 = vld [vmem:[%s1188_s15 + $0x198] sm:$0xff] }
  0x11   : > { %699 = vperm.xlu0 %1074, %v691_v7   ;;  %1076 = vset.pattern.permute.xlu1 %v1101_v5  ;;  %v345_v19 = vld [vmem:[%s1188_s15 + $0x1f0] sm:$0xff]  ;;  %v336_v22 = vld [vmem:[%s1188_s15 + $0x1a8] sm:$0xff]  ;;  %v338_v24 = vld [vmem:[%s1188_s15 + $0x1b8] sm:$0xff] }
  0x12   : > { %694 = vperm.xlu1 %1076, %v1193_v8   ;;  %401 = vmatprep.subr.bf16.mxu0 %v376_v12  ;;  %v377_v21 = vpack.c.bf16 %v345_v19, %v341_v18  ;;  %v372_v25 = vpack.c.bf16 %v336_v22, %v332_v20  ;;  %v374_v26 = vpack.c.bf16 %v338_v24, %v334_v23  ;;  %v331_v27 = vld [vmem:[%s1188_s15 + $0x180] sm:$0xff]  ;;  %v333_v29 = vld [vmem:[%s1188_s15 + $0x190] sm:$0xff]  ;;  %v324_v31 = vld [vmem:[%s1188_s15 + $0x148] sm:$0xff] }
  0x13   : > { %441 = vmatprep.subr.bf16.mxu1 %v378_v16  ;;  %402 = vmatpush1.bf16.xpose.msra.mxu0 %v375_v17  ;;  %v335_v28 = vld [vmem:[%s1188_s15 + $0x1a0] sm:$0xff]  ;;  %v337_v30 = vld [vmem:[%s1188_s15 + $0x1b0] sm:$0xff]  ;;  %v328_v32 = vld [vmem:[%s1188_s15 + $0x168] sm:$0xff] }
  0x14   : > { %442 = vmatpush1.bf16.xpose.msra.mxu1 %v377_v21  ;;  %403 = vmatprep.subr.bf16.mxu0 %v372_v25  ;;  %v326_v33 = vld [vmem:[%s1188_s15 + $0x158] sm:$0xff]  ;;  %v371_v36 = vpack.c.bf16 %v335_v28, %v331_v27  ;;  %v373_v37 = vpack.c.bf16 %v337_v30, %v333_v29  ;;  %v368_v38 = vpack.c.bf16 %v328_v32, %v324_v31  ;;  %v323_v41 = vld [vmem:[%s1188_s15 + $0x140] sm:$0xff]  ;;  %v325_v43 = vld [vmem:[%s1188_s15 + $0x150] sm:$0xff] }
  0x15   : > { %1077 = vset.pattern.permute.xlu0 %v1102_v6  ;;  %443 = vmatprep.subr.bf16.mxu1 %v374_v26  ;;  %v330_v34 = vld [vmem:[%s1188_s15 + $0x178] sm:$0xff]  ;;  %v327_v42 = vld [vmem:[%s1188_s15 + $0x160] sm:$0xff]  ;;  %v329_v44 = vld [vmem:[%s1188_s15 + $0x170] sm:$0xff] }
  0x16   : > { %715 = vperm.xlu0 %1077, %v1193_v8   ;;  %1078 = vset.pattern.permute.xlu1 %v1103_v35  ;;  %v370_v40 = vpack.c.bf16 %v330_v34, %v326_v33  ;;  %v316_v45 = vld [vmem:[%s1188_s15 + $0x108] sm:$0xff]  ;;  %v318_v47 = vld [vmem:[%s1188_s15 + $0x118] sm:$0xff]  ;;  %v367_v49 = vpack.c.bf16 %v327_v42, %v323_v41  ;;  %v369_v50 = vpack.c.bf16 %v329_v44, %v325_v43  ;;  %v315_v53 = vld [vmem:[%s1188_s15 + $0x100] sm:$0xff] }
  0x17   : > { %741 = vperm.xlu1 %1078, %v691_v7   ;;  %v320_v46 = vld [vmem:[%s1188_s15 + $0x128] sm:$0xff]  ;;  %v322_v48 = vld [vmem:[%s1188_s15 + $0x138] sm:$0xff]  ;;  %v319_v54 = vld [vmem:[%s1188_s15 + $0x120] sm:$0xff] }
  0x18   : > { %v364_v51 = vpack.c.bf16 %v320_v46, %v316_v45  ;;  %v366_v52 = vpack.c.bf16 %v322_v48, %v318_v47  ;;  %v317_v55 = vld [vmem:[%s1188_s15 + $0x110] sm:$0xff]  ;;  %v308_v57 = vld [vmem:[%s1188_s15 + $0xc8] sm:$0xff]  ;;  %v310_v59 = vld [vmem:[%s1188_s15 + $0xd8] sm:$0xff]  ;;  %v363_v61 = vpack.c.bf16 %v319_v54, %v315_v53  ;;  %v1011_v45 = vcombine.low %v1167_v0, %v1167_v0 }
  0x19   : > { %v321_v56 = vld [vmem:[%s1188_s15 + $0x130] sm:$0xff]  ;;  %v312_v58 = vld [vmem:[%s1188_s15 + $0xe8] sm:$0xff]  ;;  %v314_v60 = vld [vmem:[%s1188_s15 + $0xf8] sm:$0xff]  ;;  %v1013_v46 = vcombine.low %v1172_v1, %v1172_v1 }
  0x1a   : > { %1079 = vset.pattern.permute.xlu0 %v1104_v39  ;;  %v365_v62 = vpack.c.bf16 %v321_v56, %v317_v55  ;;  %v360_v63 = vpack.c.bf16 %v312_v58, %v308_v57  ;;  %v362_v2 = vpack.c.bf16 %v314_v60, %v310_v59  ;;  %v307_v3 = vld [vmem:[%s1188_s15 + $0xc0] sm:$0xff]  ;;  %v309_v6 = vld [vmem:[%s1188_s15 + $0xd0] sm:$0xff]  ;;  %v302_v9 = vld [vmem:[%s1188_s15 + $0x98] sm:$0xff] }
  0x1b   : > { %763 = vperm.xlu0 %1079, %v691_v7   ;;  %404 = vmatpush1.bf16.xpose.msra.mxu0 %v371_v36  ;;  %v311_v4 = vld [vmem:[%s1188_s15 + $0xe0] sm:$0xff]  ;;  %v300_v7 = vld [vmem:[%s1188_s15 + $0x88] sm:$0xff]  ;;  %v306_v10 = vld [vmem:[%s1188_s15 + $0xb8] sm:$0xff] }
  0x1c   : > { %737 = vperm.xlu1 %1078, %v1193_v8   ;;  %444 = vmatpush1.bf16.xpose.msra.mxu1 %v373_v37  ;;  %v359_v11 = vpack.c.bf16 %v311_v4, %v307_v3  ;;  %v358_v14 = vpack.c.bf16 %v306_v10, %v302_v9  ;;  %v299_v15 = vld [vmem:[%s1188_s15 + $0x80] sm:$0xff]  ;;  %v301_v17 = vld [vmem:[%s1188_s15 + $0x90] sm:$0xff]  ;;  %v292_v19 = vld [vmem:[%s1188_s15 + $0x48] sm:$0xff]  ;;  %v1106_v9 = vmov 2475754826  }
  0x1d   : > { %405 = vmatprep.subr.bf16.mxu0 %v368_v38  ;;  %445 = vmatprep.subr.bf16.mxu1 %v370_v40  ;;  %v303_v16 = vld [vmem:[%s1188_s15 + $0xa0] sm:$0xff]  ;;  %v305_v18 = vld [vmem:[%s1188_s15 + $0xb0] sm:$0xff]  ;;  %v296_v20 = vld [vmem:[%s1188_s15 + $0x68] sm:$0xff] }
  0x1e   : > { %v294_v21 = vld [vmem:[%s1188_s15 + $0x58] sm:$0xff]  ;;  %v355_v23 = vpack.c.bf16 %v303_v16, %v299_v15  ;;  %v357_v24 = vpack.c.bf16 %v305_v18, %v301_v17  ;;  %v352_v25 = vpack.c.bf16 %v296_v20, %v292_v19  ;;  %v291_v27 = vld [vmem:[%s1188_s15 + $0x40] sm:$0xff]  ;;  %v293_v29 = vld [vmem:[%s1188_s15 + $0x50] sm:$0xff]  ;;  %v1108_v15 = vmov 2102212464  }
  0x1f   : > { %1082 = vset.pattern.permute.xlu0 %v1101_v5  ;;  %v298_v22 = vld [vmem:[%s1188_s15 + $0x78] sm:$0xff]  ;;  %v295_v28 = vld [vmem:[%s1188_s15 + $0x60] sm:$0xff]  ;;  %v297_v30 = vld [vmem:[%s1188_s15 + $0x70] sm:$0xff]  ;;  %v1109_v18 = vmov 920167782  }
  0x20   : > { %1080 = vset.pattern.permute.xlu1 %v1104_v39  ;;  %v354_v26 = vpack.c.bf16 %v298_v22, %v294_v21  ;;  %v284_v31 = vld [vmem:[%s1188_s15 + $0x8] sm:$0xff]  ;;  %v286_v33 = vld [vmem:[%s1188_s15 + $0x18] sm:$0xff]  ;;  %v351_v35 = vpack.c.bf16 %v295_v28, %v291_v27  ;;  %v353_v36 = vpack.c.bf16 %v297_v30, %v293_v29  ;;  %v283_v39 = vld [vmem:[%s1188_s15] sm:$0xff]  ;;  %v1110_v21 = vmov 1326507024  }
  0x21   : > { %759 = vperm.xlu1 %1080, %v1193_v8   ;;  %v304_v8 = vld [vmem:[%s1188_s15 + $0xa8] sm:$0xff]  ;;  %v290_v34 = vld [vmem:[%s1188_s15 + $0x38] sm:$0xff]  ;;  %v287_v40 = vld [vmem:[%s1188_s15 + $0x20] sm:$0xff] }
  0x22   : > { %v356_v13 = vpack.c.bf16 %v304_v8, %v300_v7  ;;  %v288_v32 = vld [vmem:[%s1188_s15 + $0x28] sm:$0xff]  ;;  %v350_v38 = vpack.c.bf16 %v290_v34, %v286_v33  ;;  %v285_v41 = vld [vmem:[%s1188_s15 + $0x10] sm:$0xff]  ;;  %v347_v43 = vpack.c.bf16 %v287_v40, %v283_v39  ;;  %v782_v47 = vld [vmem:[%s1318_s4] sm:$0xff]  ;;  %v1105_v7 = vmov 683565275  }
  0x23   : > { %406 = vmatpush1.bf16.xpose.msra.mxu0 %v367_v49  ;;  %v348_v37 = vpack.c.bf16 %v288_v32, %v284_v31  ;;  %v289_v42 = vld [vmem:[%s1188_s15 + $0x30] sm:$0xff] }
  0x24   : > { %446 = vmatpush1.bf16.xpose.msra.mxu1 %v369_v50  ;;  %407 = vmatprep.subr.bf16.mxu0 %v364_v51  ;;  %v349_v44 = vpack.c.bf16 %v289_v42, %v285_v41 }
  0x25   : > { %447 = vmatprep.subr.bf16.mxu1 %v366_v52  ;;  %1081 = vset.pattern.permute.xlu1 %v1101_v5  ;;  %v313_v5 = vld [vmem:[%s1188_s15 + $0xf0] sm:$0xff] }
  0x26   : > { %v361_v12 = vpack.c.bf16 %v313_v5, %v309_v6 }
  0x2b   : > { %408 = vmatpush1.bf16.xpose.msra.mxu0 %v363_v61 }
  0x2c   : > { %448 = vmatpush1.bf16.xpose.msra.mxu1 %v365_v62  ;;  %409 = vmatprep.subr.bf16.mxu0 %v360_v63 }
  0x2d   : > { %449 = vmatprep.subr.bf16.mxu1 %v362_v2 }
  0x33   : > { %410 = vmatpush1.bf16.xpose.msra.mxu0 %v359_v11 }
  0x34   : > { %450 = vmatpush1.bf16.xpose.msra.mxu1 %v361_v12  ;;  %411 = vmatprep.subr.bf16.mxu0 %v356_v13  ;;  %v1107_v12 = vmov 2131351028  }
  0x35   : > { %451 = vmatprep.subr.bf16.mxu1 %v358_v14 }
  0x3b   : > { %412 = vmatpush1.bf16.xpose.msra.mxu0 %v355_v23 }
  0x3c   : > { %452 = vmatpush1.bf16.xpose.msra.mxu1 %v357_v24  ;;  %413 = vmatprep.subr.bf16.mxu0 %v352_v25 }
  0x3d   : > { %453 = vmatprep.subr.bf16.mxu1 %v354_v26 }
  0x43   : > { %414 = vmatpush1.bf16.xpose.msra.mxu0 %v351_v35 }
  0x44   : > { %454 = vmatpush1.bf16.xpose.msra.mxu1 %v353_v36  ;;  %415 = vmatprep.subr.bf16.mxu0 %v348_v37 }
  0x45   : > { %455 = vmatprep.subr.bf16.mxu1 %v350_v38 }
  0x4b   : > { %416 = vmatpush1.bf16.xpose.msra.mxu0 %v347_v43 }
  0x4c   : > { %456 = vmatpush1.bf16.xpose.msra.mxu1 %v349_v44 }
  0x52   : > { %434 = vmatmul.mubr.bf16.vlgmr.msra.gmra.mxu0 %v1011_v45 }
  0x53   : > { %474 = vmatmul.mubr.bf16.vlgmr.msra.gmra.mxu1 %v1013_v46  ;;  %1040 = vmatprep.mubr.msk.f32.mxu0 %vm784_vm0, %v782_v47 }
  0x88   : > { %v385_v48 = vpop.permute.xlu0 %384 }
 0x112   : > { %v435_v49 = vpop.f32.mrf.mxu0 }
 0x113   : > { %v436_v50 = vadd.f32 %v435_v49, %v385_v48  ;;  %v475_v51 = vpop.f32.mrf.mxu1 }
 0x114   : > { %v437_v52 = vpop.f32.mrf.mxu0 }
 0x115   : > { %v476_v53 = vadd.f32 %v475_v51, %v436_v50  ;;  %v477_v54 = vpop.f32.mrf.mxu1 }
 0x116   : > { %v438_v0 = vpop.f32.mrf.mxu0 }
 0x117   : > { %1087 = vtanh.f32 %v476_v53  ;;  %v478_v55 = vpop.f32.mrf.mxu1 }
 0x118   : > { %v439_v1 = vpop.f32.mrf.mxu0 }
 0x119   : > { %v479_v56 = vpop.f32.mrf.mxu1 }
 0x124   : > { %v1088_v57 = vpop.eup %1087 }
 0x125   : > { %v1274_v58 = vmul.f32 0.7853982, %v1088_v57 }
 0x127   : > { %v486_v59 = vand.u32 2139095040, %v1274_v58  ;;  %v483_v63 = vand.u32 2147483647, %v1274_v58  ;;  %vm485_vm8 = vcmp.lt.s32.totalorder %v1274_v58, 0 }
 0x129   : > { %v487_v60 = vshrl.u32 %v486_v59, 23  ;;  %v490_v4 = vand.u32 8388607, %v483_v63  ;;  %vm484_vm9 = vcmp.le.f32.partialorder %v483_v63, 0.7853982 }
 0x12b   : > { %v1015_v61 = vadd.s32 4294967169, %v487_v60  ;;  %v491_v23 = vor.u32 8388608, %v490_v4 }
 0x12d   : > { %v493_v62 = vadd.s32 1, %v1015_v61  ;;  %v531_v37 = vshll.u32 %v491_v23, 8 }
 0x12f   : > { %vm494_vm1 = vcmp.gt.s32.totalorder %v493_v62, 0 }
 0x130   : > { %v495_v2 = vsel %vm494_vm1, %v493_v62, 0  ;;  %vm575_vm1 = vweird.f32 %v1274_v58 }
 0x131   : > { %v497_v3 = vand.u32 31, %v495_v2  ;;  %v496_v5 = vshrl.u32 %v495_v2, 5 }
 0x133   : > { %v498_v6 = vsub.s32 32, %v497_v3  ;;  %v500_v8 = vshll.u32 %v1105_v7, %v497_v3  ;;  %v503_v10 = vshll.u32 %v1106_v9, %v497_v3  ;;  %v506_v14 = vshll.u32 %v1107_v12, %v497_v3 }
 0x134   : > { %v509_v17 = vshll.u32 %v1108_v15, %v497_v3  ;;  %v512_v20 = vshll.u32 %v1109_v18, %v497_v3  ;;  %vm515_vm2 = vcmp.lt.s32.totalorder %v496_v5, 1  ;;  %vm518_vm3 = vcmp.lt.s32.totalorder %v496_v5, 4 }
 0x135   : > { %v501_v11 = vshrl.u32 %v1106_v9, %v498_v6  ;;  %v504_v13 = vshrl.u32 %v1107_v12, %v498_v6  ;;  %v507_v16 = vshrl.u32 %v1108_v15, %v498_v6  ;;  %v510_v19 = vshrl.u32 %v1109_v18, %v498_v6 }
 0x136   : > { %v513_v22 = vshrl.u32 %v1110_v21, %v498_v6  ;;  %v499_v32 = vshrl.u32 %v1105_v7, %v498_v6  ;;  %vm517_vm4 = vcmp.lt.s32.totalorder %v496_v5, 3  ;;  %vm516_vm5 = vcmp.lt.s32.totalorder %v496_v5, 2  ;;  %v700_v21 = vpop.permute.xlu0 %699 }
 0x137   : > { %v502_v24 = vor.u32 %v501_v11, %v500_v8  ;;  %v505_v25 = vor.u32 %v504_v13, %v503_v10  ;;  %v508_v26 = vor.u32 %v507_v16, %v506_v14  ;;  %v511_v27 = vor.u32 %v510_v19, %v509_v17  ;;  %v720_v11 = vpop.permute.xlu1 %719 }
 0x138   : > { %v514_v28 = vor.u32 %v513_v22, %v512_v20  ;;  %v702_v18 = vlaneseq }
 0x139   : > { %v520_v29 = vsel %vm518_vm3, %v508_v26, 2102212464  ;;  %v523_v30 = vsel %vm515_vm2, %v502_v24, %v505_v25  ;;  %v527_v31 = vsel %vm515_vm2, %v505_v25, %v508_v26  ;;  %v524_v33 = vsel %vm518_vm3, %v511_v27, 920167782 }
 0x13a   : > { %v528_v34 = vsel %vm518_vm3, %v514_v28, 1326507024  ;;  %v525_v35 = vsel %vm517_vm4, %v508_v26, %v524_v33  ;;  %v519_v38 = vsel %vm515_vm2, %v499_v32, %v502_v24  ;;  %v521_v39 = vsel %vm517_vm4, %v505_v25, %v520_v29 }
 0x13b   : > { %v529_v36 = vsel %vm517_vm4, %v511_v27, %v528_v34  ;;  %v526_v40 = vsel %vm516_vm5, %v523_v30, %v525_v35  ;;  %v522_v46 = vsel %vm516_vm5, %v519_v38, %v521_v39  ;;  %v695_v16 = vpop.permute.xlu1 %694  ;;  %v703_v22 = vshrl.u32 %v702_v18, 7 }
 0x13c   : > { %v530_v41 = vsel %vm516_vm5, %v527_v31, %v529_v36  ;;  %v1283_v44 = vmul.u32.u64.low %v531_v37, %v526_v40  ;;  %v1284_v45 = vmul.u32.u64.high %v531_v37, %v526_v40, %v1283_v44  ;;  %v538_v48 = vmul.u32 %v531_v37, %v522_v46  ;;  %v716_v31 = vpop.permute.xlu0 %715 }
 0x13d   : > { %v1280_v42 = vmul.u32.u64.low %v531_v37, %v530_v41  ;;  %v1281_v43 = vmul.u32.u64.high %v531_v37, %v530_v41, %v1280_v42  ;;  %v724_v27 = vsub.s32 1, %v703_v22  ;;  %v704_v29 = vsub.s32 0, %v703_v22 }
 0x13e   : > { %v541_v47 = vadd.s32 1, %v1284_v45  ;;  %v746_v63 = vsub.s32 2, %v703_v22  ;;  %v768_v33 = vsub.s32 3, %v703_v22  ;;  %vm1112_vm2 = vmmov 0  }
 0x13f   : > { %vm540_vm6 = vc.u32 %v1281_v43, %v1283_v44  ;;  %v539_v59 = vadd.s32 %v1283_v44, %v1281_v43  ;;  %v742_v20 = vpop.permute.xlu1 %741 }
 0x140   : > { %v542_v49 = vsel %vm540_vm6, %v541_v47, %v1284_v45  ;;  %v764_v46 = vpop.permute.xlu0 %763 }
 0x141   : > { %v543_v50 = vadd.s32 %v542_v49, %v538_v48 }
 0x143   : > { %v544_v51 = vadd.s32 536870912, %v543_v50  ;;  %v738_v30 = vpop.permute.xlu1 %737 }
 0x145   : > { %v545_v52 = vshrl.u32 %v544_v51, 30 }
 0x147   : > { %v546_v53 = vshll.u32 %v545_v52, 30  ;;  %v569_v12 = vsub.s32 4, %v545_v52  ;;  %v760_v45 = vpop.permute.xlu1 %759 }
 0x149   : > { %v547_v54 = vsub.s32 %v543_v50, %v546_v53  ;;  %v570_v15 = vsel %vm485_vm8, %v569_v12, %v545_v52 }
 0x14a   : > { %v572_v17 = vsel %vm484_vm9, 0, %v570_v15  ;;  %v869_v15 = vld [vmem:[%s1320_s6] sm:$0xff] }
 0x14b   : > { %v549_v0 = vsub.s32 0, %v547_v54  ;;  %v679_v19 = vadd.s32 3, %v572_v17  ;;  %v576_v23 = vand.u32 3, %v572_v17  ;;  %872 = vperm.xlu1 %1081, %v869_v15  }
 0x14d   : > { %v1016_v55 = vmin.u32 %v549_v0, %v547_v54  ;;  %v680_v24 = vand.u32 3, %v679_v19  ;;  %vm581_vm10 = vcmp.eq.s32.totalorder %v576_v23, 2  ;;  %vm578_vm12 = vcmp.eq.s32.totalorder %v576_v23, 0 }
 0x14e   : > { %vm577_vm14 = vcmp.lt.s32.totalorder %v576_v23, 2 }
 0x14f   : > { %v551_v1 = vclz %v1016_v55  ;;  %vm685_vm11 = vcmp.eq.s32.totalorder %v680_v24, 2  ;;  %vm682_vm13 = vcmp.eq.s32.totalorder %v680_v24, 0  ;;  %vm681_vm15 = vcmp.lt.s32.totalorder %v680_v24, 2 }
 0x151   : > { %v1017_v56 = vadd.s32 4294967294, %v551_v1 }
 0x153   : > { %vm1018_vm7 = vcmp.lt.s32.totalorder %v1017_v56, 0 }
 0x154   : > { %v554_v57 = vsel %vm1018_vm7, 0, %v1017_v56 }
 0x155   : > { %v555_v60 = vsub.s32 32, %v554_v57  ;;  %v559_v61 = vsub.s32 4294967266, %v554_v57  ;;  %v556_v62 = vshll.u32 %v547_v54, %v554_v57 }
 0x157   : > { %v557_v2 = vshrl.u32 %v539_v59, %v555_v60  ;;  %v560_v3 = vadd.s32 127, %v559_v61 }
 0x159   : > { %v558_v4 = vor.u32 %v557_v2, %v556_v62  ;;  %v561_v6 = vshll.u32 %v560_v3, 23 }
 0x15b   : > { %v562_v5 = vor.u32 4788187, %v561_v6  ;;  %v565_v8 = vcvt.s32.f32 %v558_v4 }
 0x15d   : > { %v563_v7 = vand.u32 2147483647, %v562_v5 }
 0x15f   : > { %v566_v9 = vmul.f32 %v565_v8, %v563_v7 }
 0x161   : > { %v567_v10 = vxor.u32 2147483648, %v566_v9 }
 0x163   : > { %v568_v13 = vsel %vm485_vm8, %v567_v10, %v566_v9 }
 0x164   : > { %v571_v14 = vsel %vm484_vm9, %v1274_v58, %v568_v13  ;;  %v783_v13 = vld [vmem:[%s1318_s4 + $0x8] sm:$0xff] }
 0x165   : > { %1089 = vcosq.f32 %v571_v14 }
 0x166   : > { %1091 = vsinq.f32 %v571_v14  ;;  %v1111_v14 = vmov 0.0  }
 0x167   : > { %1043 = vmatprep.subr.mxu1 %v1111_v14  ;;  %1047 = vmatprep.mubr.msk.f32.mxu1 %vm1112_vm2, %v1111_v14 }
 0x172   : > { %v1090_v25 = vpop.eup %1089 }
 0x173   : > { %v1092_v26 = vpop.eup %1091  ;;  %v582_v28 = vxor.u32 2147483648, %v1090_v25 }
 0x174   : > { %v579_v32 = vxor.u32 2147483648, %v1092_v26 }
 0x175   : > { %v583_v34 = vsel %vm581_vm10, %v582_v28, %v1092_v26  ;;  %v687_v35 = vsel %vm685_vm11, %v582_v28, %v1092_v26 }
 0x176   : > { %v580_v36 = vsel %vm578_vm12, %v1090_v25, %v579_v32  ;;  %v684_v37 = vsel %vm682_vm13, %v1090_v25, %v579_v32 }
 0x177   : > { %v584_v38 = vsel %vm577_vm14, %v580_v36, %v583_v34  ;;  %v688_v39 = vsel %vm681_vm15, %v684_v37, %v687_v35 }
 0x178   : > { %v585_v40 = vsel %vm575_vm1, nan, %v584_v38  ;;  %v689_v41 = vsel %vm575_vm1, nan, %v688_v39 }
 0x179   : > { %v725_v42 = vrot.slane %v689_v41, %v724_v27  ;;  %v731_v43 = vrot.slane %v585_v40, %v724_v27  ;;  %v705_v44 = vrot.slane %v689_v41, %v704_v29  ;;  %v711_v47 = vrot.slane %v585_v40, %v704_v29 }
 0x17a   : > { %v747_v48 = vrot.slane %v689_v41, %v746_v63  ;;  %v753_v49 = vrot.slane %v585_v40, %v746_v63  ;;  %v769_v50 = vrot.slane %v689_v41, %v768_v33  ;;  %v775_v61 = vrot.slane %v585_v40, %v768_v33 }
 0x17b   : > { %v727_v51 = vmul.f32 %v725_v42, %v720_v11  ;;  %v706_v52 = vmul.f32 %v705_v44, %v695_v16  ;;  %v707_v53 = vmul.f32 %v705_v44, %v700_v21  ;;  %v726_v54 = vmul.f32 %v725_v42, %v716_v31 }
 0x17c   : > { %v749_v0 = vmul.f32 %v747_v48, %v742_v20  ;;  %v748_v55 = vmul.f32 %v747_v48, %v738_v30  ;;  %v770_v58 = vmul.f32 %v769_v50, %v760_v45  ;;  %v771_v1 = vmul.f32 %v769_v50, %v764_v46  ;;  %v866_v20 = vld [vmem:[%s1319_s5] sm:$0xff] }
 0x17d   : > { %v733_v56 = vadd.f32 %v731_v43, %v727_v51  ;;  %v712_v57 = vadd.f32 %v711_v47, %v706_v52  ;;  %v713_v59 = vadd.f32 %v711_v47, %v707_v53  ;;  %v732_v60 = vadd.f32 %v731_v43, %v726_v54 }
 0x17e   : > { %v755_v2 = vadd.f32 %v753_v49, %v749_v0  ;;  %v754_v3 = vadd.f32 %v753_v49, %v748_v55  ;;  %v776_v5 = vadd.f32 %v775_v61, %v770_v58  ;;  %v777_v7 = vadd.f32 %v775_v61, %v771_v1 }
 0x17f   : > { %v735_v62 = vmul.f32 %v733_v56, %v713_v59  ;;  %v734_v4 = vmul.f32 %v732_v60, %v712_v57 }
 0x181   : > { %v757_v6 = vmul.f32 %v755_v2, %v735_v62  ;;  %v756_v8 = vmul.f32 %v754_v3, %v734_v4 }
 0x183   : > { %v779_v9 = vmul.f32 %v777_v7, %v757_v6  ;;  %v778_v10 = vmul.f32 %v776_v5, %v756_v8 }
 0x185   : > { %v781_v11 = vmul.f32 0.25, %v779_v9  ;;  %v780_v12 = vmul.f32 0.25, %v778_v10 }
 0x187   : > { %1036 = vmatprep.subr.mxu0 %v781_v11 }
 0x188   : > { %1037 = vmatpush3.msra.mxu0 %v781_v11 }
 0x189   : > { %1038 = vmatprep.subr.mxu0 %v780_v12 }
 0x18a   : > { %1039 = vmatpush3.msra.mxu0 %v780_v12 }
 0x18b   : > { %1041 = vmatmul.mubr.msk.f32.vlgmr.msra.gmra.mxu0 %vm784_vm0, %v783_v13 }
 0x1c6   : > { %v873_v21 = vpop.permute.xlu1 %872 }
 0x24b   : > { %v1042_v16 = vpop.f32.mrf.mxu0 }
 0x24c   : > { %v868_v17 = vmul.f32 %v1042_v16, %v1042_v16 }
 0x24d   : > { %v857_v18 = vpop.f32.mrf.mxu0 }
 0x24e   : > { %v867_v19 = vmul.f32 %v857_v18, %v857_v18  ;;  %1044 = vmatpush3.msra.mxu1 %v868_v17 }
 0x24f   : > { %1045 = vmatprep.subr.mxu1 %v1111_v14 }
 0x250   : > { %1046 = vmatpush3.msra.mxu1 %v867_v19 }
 0x251   : > { %1048 = vmatmul.mubr.msk.f32.vlgmr.msra.gmra.mxu1 %vm784_vm0, %v866_v20 }
 0x311   : > { %v944_v22 = vpop.f32.mrf.mxu1 }
 0x312   : > { %v945_v23 = vadd.f32 %v944_v22, %v873_v21 }
 0x313   : > { %v1049_v24 = vpop.f32.mrf.mxu1 }
 0x314   : > { %948 = vst [vmem:[%s281_s8] sm:$0xff] %v945_v23 }
 0x315 PF: > { %s17_s24 = sadd.s32 1, %s1099_s24  }
 0x316   : > { %p14_p5 = scmp.ge.s32.totalorder %s17_s24, 4  }
 0x318   :  { %16 = sbr.rel (!%p14_p5) target bundleno = 1 (0x1), region = 78 }

</bundles_post_ra>
